<compile_context>
chip_gen: v5e
topology: v5e:2x2
jax: 0.10.0
libtpu: 0.0.40
codegen_flags: <defaults>
</compile_context>

<pallas_src>
import functools
import math

import jax
import jax.numpy as jnp
from jax import lax
from jax.experimental import pallas as pl
from jax.experimental.pallas import tpu as pltpu


def _round_up(x, m):
    return (x + m - 1) // m * m


def _xblock_kernel(xt_ref, w_ref, b_ref, out_ref, *, c, cs, mm_dtype):
    """One batch element, channel-transposed layout.

    xt_ref : (1, C, N)   flattened image slab, N = H*W on the lane dim
    w_ref  : (3*Cs, C)   fused [Wq/sqrt(dk); Wk; Wv], each zero-padded to Cs rows
    b_ref  : (3*Cs, 1)   fused matching biases (zero in padded rows)
    out_ref: (1, C, N)   residual + self-attention output (transposed layout)
    """
    y = xt_ref[0]                                        # (C, N) f32
    w = w_ref[...]                                       # (3Cs, C) f32
    b = b_ref[...]                                       # (3Cs, 1) f32

    # Fused QKV projection: single MXU call, lane-dense output over N.
    qkv = jnp.dot(w.astype(mm_dtype), y.astype(mm_dtype),
                  preferred_element_type=jnp.float32) + b            # (3Cs, N)

    qt = qkv[0 * cs:1 * cs]          # (Cs, N), already scaled by 1/sqrt(dk)
    kt = qkv[1 * cs:2 * cs]          # (Cs, N)
    vt = qkv[2 * cs:3 * cs]          # (Cs, N)

    # att[i, j] = sum_n q[n, i] * k[n, j]  -> contraction over the lane dim N.
    att = lax.dot_general(qt.astype(mm_dtype), kt.astype(mm_dtype),
                          (((1,), (1,)), ((), ())),
                          preferred_element_type=jnp.float32)        # (Cs, Cs)

    if cs != c:
        # Mask the zero-padded channel columns out of the softmax.
        col = lax.broadcasted_iota(jnp.int32, (cs, cs), 1)
        att = jnp.where(col < c, att, -1e30)

    # Softmax along the last dim (kept in f32); reciprocal on the EUP slot.
    m = jnp.max(att, axis=-1, keepdims=True)
    e = jnp.exp(att - m)
    s = jnp.sum(e, axis=-1, keepdims=True)
    p = e * pl.reciprocal(s, approx=True)                            # (Cs, Cs)

    # sa^T = att^T @ v^T : lane-dense (Cs, N) output, contraction over channels.
    sat = lax.dot_general(p.astype(mm_dtype), vt.astype(mm_dtype),
                          (((0,), (0,)), ((), ())),
                          preferred_element_type=jnp.float32)        # (Cs, N)

    # Residual add in the flattened (transposed) layout; drop padded rows.
    out_ref[0] = y + sat[0:c]


def xblock_forward(images, wq, bq, wk, bk, wv, bv, dk, *, mm_dtype=jnp.float32):
    """images: (B, C, H, W) f32.  wq/wk/wv: (C, C) PyTorch Linear weights
    (out, in); bq/bk/bv: (C,) biases.  dk: static Python scalar.
    Returns (B, C, H, W) f32."""
    B, C, H, W = images.shape
    N = H * W
    Cs = _round_up(C, 8)       # sublane-aligned per-segment padding

    # Exact equivalent of torch `images.view(B, -1, C)` (raw reinterpretation,
    # NOT a permute), then put N on the lane (last) dim for the kernel.
    flat_t = jnp.swapaxes(images.reshape(B, N, C), 1, 2)             # (B, C, N)

    # Fold 1/sqrt(dk) into the Q projection (one-time); fuse + pad weights.
    rs = 1.0 / math.sqrt(float(dk))   # dk is static config -> math.sqrt

    def seg(w, b):
        wp = jnp.zeros((Cs, C), jnp.float32).at[:C, :].set(w.astype(jnp.float32))
        bp = jnp.zeros((Cs, 1), jnp.float32).at[:C, 0].set(b.astype(jnp.float32))
        return wp, bp

    wq_p, bq_p = seg(wq * rs, bq * rs)
    wk_p, bk_p = seg(wk, bk)
    wv_p, bv_p = seg(wv, bv)
    w_cat = jnp.concatenate([wq_p, wk_p, wv_p], axis=0)              # (3Cs, C)
    b_cat = jnp.concatenate([bq_p, bk_p, bv_p], axis=0)              # (3Cs, 1)

    kernel = functools.partial(_xblock_kernel, c=C, cs=Cs, mm_dtype=mm_dtype)

    # Scoped-VMEM sized to the real working set (double-buffered in/out blocks
    # + live intermediates), clamped to v7x's 64 MiB physical VMEM.
    elt = 4
    est = (4 * C * N + 6 * Cs * N + 3 * Cs * (C + 1)) * elt + (2 << 20)
    vmem_limit = int(min(max(est, 16 << 20), 64 << 20))

    cost = pl.CostEstimate(
        flops=2 * B * N * (3 * C * Cs + 2 * Cs * Cs),
        transcendentals=B * Cs * (Cs + 1),
        bytes_accessed=2 * B * N * C * elt + 3 * Cs * (C + 1) * elt,
    )

    out_t = pl.pallas_call(
        kernel,
        out_shape=jax.ShapeDtypeStruct((B, C, N), jnp.float32),
        grid_spec=pltpu.PrefetchScalarGridSpec(
            num_scalar_prefetch=0,
            grid=(B,),
            in_specs=[
                pl.BlockSpec((1, C, N), lambda b: (b, 0, 0)),      # x^T slab
                pl.BlockSpec((3 * Cs, C), lambda b: (0, 0)),       # fused W
                pl.BlockSpec((3 * Cs, 1), lambda b: (0, 0)),       # fused b
            ],
            out_specs=pl.BlockSpec((1, C, N), lambda b: (b, 0, 0)),
        ),
        compiler_params=pltpu.CompilerParams(
            dimension_semantics=("parallel",),
            vmem_limit_bytes=vmem_limit,
        ),
        cost_estimate=cost,
    )(flat_t, w_cat, b_cat)

    # Undo the lane-layout transpose; equivalent of `attention.view(-1,C,H,W)`
    # plus residual (residual already added in-kernel in flattened layout).
    return jnp.swapaxes(out_t, 1, 2).reshape(B, C, H, W)


def _reference_forward(images, wq, bq, wk, bk, wv, bv, dk):
    """Plain-JAX replica of the PyTorch forward for a correctness check."""
    B, C, H, W = images.shape
    flat = images.reshape(B, -1, C)                       # (B, N, C)
    q = flat @ wq.T + bq
    k = flat @ wk.T + bk
    v = flat @ wv.T + bv
    q = jnp.transpose(q, (0, 2, 1))                       # (B, C, N)
    att = jnp.matmul(q, k) / math.sqrt(float(dk))         # (B, C, C)
    att = jax.nn.softmax(att, axis=-1)
    sa = jnp.matmul(v, att)                               # (B, N, C)
    return images + sa.reshape(B, C, H, W)


if __name__ == "__main__":
    # Small shapes consistent with the module: batch=2, channels=4, 16x16 spatial.
    B, C, H, W = 2, 4, 16, 16
    dk = float(C)  # attention_scaling_factor

    key = jax.random.PRNGKey(0)
    k_img, k_wq, k_bq, k_wk, k_bk, k_wv, k_bv = jax.random.split(key, 7)

    images = jax.random.normal(k_img, (B, C, H, W), dtype=jnp.float32)

    # Deterministic parameter init (shapes match nn.Linear(C, C, bias=True)).
    scale = 1.0 / math.sqrt(C)
    wq = jax.random.uniform(k_wq, (C, C), jnp.float32, -scale, scale)
    bq = jax.random.uniform(k_bq, (C,), jnp.float32, -scale, scale)
    wk = jax.random.uniform(k_wk, (C, C), jnp.float32, -scale, scale)
    bk = jax.random.uniform(k_bk, (C,), jnp.float32, -scale, scale)
    wv = jax.random.uniform(k_wv, (C, C), jnp.float32, -scale, scale)
    bv = jax.random.uniform(k_bv, (C,), jnp.float32, -scale, scale)

    out = xblock_forward(images, wq, bq, wk, bk, wv, bv, dk)
    out = jax.block_until_ready(out)

    ref = _reference_forward(images, wq, bq, wk, bk, wv, bv, dk)
    assert out.shape == (B, C, H, W)
    # Tolerance accounts for the EUP approximate reciprocal in the softmax;
    # structural errors (wrong transpose/view) would be O(1) and still caught.
    assert jnp.allclose(out, ref, rtol=1e-2, atol=1e-2), "mismatch vs reference"

    print("KERNEL_OK")
</pallas_src>

<mosaic_0001>
module attributes {stable_mosaic.version = 11 : i64} {
  func.func @_xblock_kernel(%arg0: i32, %arg1: memref<1x4x256xf32, #tpu.memory_space<vmem>>, %arg2: memref<24x4xf32, #tpu.memory_space<vmem>>, %arg3: memref<24x1xf32, #tpu.memory_space<vmem>>, %arg4: memref<1x4x256xf32, #tpu.memory_space<vmem>>) attributes {dimension_semantics = [#tpu.dimension_semantics<parallel>], iteration_bounds = array<i64: 2>, scalar_prefetch = 0 : i64, scratch_operands = 0 : i64, tpu.core_type = #tpu.core_type<tc>, window_params = [{transform_indices = @transform_0, window_bounds = array<i64: 1, 4, 256>}, {pipeline_mode = #tpu.pipeline_mode<synchronous>, transform_indices = @transform_1, window_bounds = array<i64: 24, 4>}, {pipeline_mode = #tpu.pipeline_mode<synchronous>, transform_indices = @transform_2, window_bounds = array<i64: 24, 1>}, {transform_indices = @transform_3, window_bounds = array<i64: 1, 4, 256>}]} {
    %c0 = arith.constant 0 : index
    %c0_0 = arith.constant 0 : index
    %c0_1 = arith.constant 0 : index
    %0 = vector.load %arg1[%c0, %c0_0, %c0_1] : memref<1x4x256xf32, #tpu.memory_space<vmem>>, vector<1x4x256xf32>
    %1 = vector.shape_cast %0 : vector<1x4x256xf32> to vector<4x256xf32>
    %c0_2 = arith.constant 0 : index
    %c0_3 = arith.constant 0 : index
    %2 = vector.load %arg2[%c0_2, %c0_3] : memref<24x4xf32, #tpu.memory_space<vmem>>, vector<24x4xf32>
    %c0_4 = arith.constant 0 : index
    %c0_5 = arith.constant 0 : index
    %3 = vector.load %arg3[%c0_4, %c0_5] : memref<24x1xf32, #tpu.memory_space<vmem>>, vector<24x1xf32>
    %cst = arith.constant dense<0.000000e+00> : vector<24x256xf32>
    %4 = tpu.matmul %2, %1, %cst {dimension_numbers = #tpu.dot_dimension_numbers<[1], [0], [0], [1], [0, 0, 1, 1], [], []>} : vector<24x4xf32>, vector<4x256xf32>, vector<24x256xf32> -> vector<24x256xf32>
    %5 = vector.broadcast %3 : vector<24x1xf32> to vector<24x256xf32>
    %6 = arith.addf %4, %5 : vector<24x256xf32>
    %7 = vector.extract_strided_slice %6 {offsets = [0, 0], sizes = [8, 256], strides = [1, 1]} : vector<24x256xf32> to vector<8x256xf32>
    %8 = vector.extract_strided_slice %6 {offsets = [8, 0], sizes = [8, 256], strides = [1, 1]} : vector<24x256xf32> to vector<8x256xf32>
    %9 = vector.extract_strided_slice %6 {offsets = [16, 0], sizes = [8, 256], strides = [1, 1]} : vector<24x256xf32> to vector<8x256xf32>
    %cst_6 = arith.constant dense<0.000000e+00> : vector<8x8xf32>
    %10 = tpu.matmul %7, %8, %cst_6 {dimension_numbers = #tpu.dot_dimension_numbers<[1], [1], [0], [0], [0, 0, 1, 0], [], []>} : vector<8x256xf32>, vector<8x256xf32>, vector<8x8xf32> -> vector<8x8xf32>
    %11 = tpu.iota {dimensions = array<i32: 1>} : vector<8x8xi32>
    %c4_i32 = arith.constant 4 : i32
    %12 = vector.broadcast %c4_i32 : i32 to vector<8x8xi32>
    %13 = arith.cmpi slt, %11, %12 : vector<8x8xi32>
    %cst_7 = arith.constant -1.000000e+30 : f32
    %14 = vector.broadcast %cst_7 : f32 to vector<8x8xf32>
    %15 = arith.select %13, %10, %14 : vector<8x8xi1>, vector<8x8xf32>
    %cst_8 = arith.constant dense<0xFF800000> : vector<8xf32>
    %16 = vector.multi_reduction <maximumf>, %15, %cst_8 [1] : vector<8x8xf32> to vector<8xf32>
    %17 = vector.shape_cast %16 : vector<8xf32> to vector<8x1xf32>
    %18 = vector.broadcast %17 : vector<8x1xf32> to vector<8x8xf32>
    %19 = arith.subf %15, %18 : vector<8x8xf32>
    %20 = math.exp %19 : vector<8x8xf32>
    %cst_9 = arith.constant dense<0.000000e+00> : vector<8xf32>
    %21 = vector.multi_reduction <add>, %20, %cst_9 [1] : vector<8x8xf32> to vector<8xf32>
    %22 = vector.shape_cast %21 : vector<8xf32> to vector<8x1xf32>
    %23 = tpu.reciprocal %22 {approx = true} : vector<8x1xf32> -> vector<8x1xf32>
    %24 = vector.broadcast %23 : vector<8x1xf32> to vector<8x8xf32>
    %25 = arith.mulf %20, %24 : vector<8x8xf32>
    %cst_10 = arith.constant dense<0.000000e+00> : vector<8x256xf32>
    %26 = tpu.matmul %25, %9, %cst_10 {dimension_numbers = #tpu.dot_dimension_numbers<[0], [0], [1], [1], [0, 1, 1, 1], [], []>} : vector<8x8xf32>, vector<8x256xf32>, vector<8x256xf32> -> vector<8x256xf32>
    %27 = vector.extract_strided_slice %26 {offsets = [0, 0], sizes = [4, 256], strides = [1, 1]} : vector<8x256xf32> to vector<4x256xf32>
    %28 = arith.addf %1, %27 : vector<4x256xf32>
    %c0_11 = arith.constant 0 : index
    %c0_12 = arith.constant 0 : index
    %c0_13 = arith.constant 0 : index
    %29 = vector.load %arg4[%c0_11, %c0_12, %c0_13] : memref<1x4x256xf32, #tpu.memory_space<vmem>>, vector<1x4x256xf32>
    %30 = vector.shape_cast %29 : vector<1x4x256xf32> to vector<4x256xf32>
    %31 = vector.shape_cast %28 : vector<4x256xf32> to vector<1x4x256xf32>
    tpu.vector_store %arg4[%c0_11, %c0_12, %c0_13], %31 {strides = array<i32>} : memref<1x4x256xf32, #tpu.memory_space<vmem>>, vector<1x4x256xf32>,
    return
  }
  func.func @transform_0(%arg0: i32) -> (i32, i32, i32) {
    %c0_i32 = arith.constant 0 : i32
    %c0_i32_0 = arith.constant 0 : i32
    %c0_i32_1 = arith.constant 0 : i32
    return %arg0, %c0_i32, %c0_i32_0 : i32, i32, i32
  }
  func.func @transform_1(%arg0: i32) -> (i32, i32) {
    %c0_i32 = arith.constant 0 : i32
    %c0_i32_0 = arith.constant 0 : i32
    %c0_i32_1 = arith.constant 0 : i32
    return %c0_i32, %c0_i32_0 : i32, i32
  }
  func.func @transform_2(%arg0: i32) -> (i32, i32) {
    %c0_i32 = arith.constant 0 : i32
    %c0_i32_0 = arith.constant 0 : i32
    %c0_i32_1 = arith.constant 0 : i32
    return %c0_i32, %c0_i32_0 : i32, i32
  }
  func.func @transform_3(%arg0: i32) -> (i32, i32, i32) {
    %c0_i32 = arith.constant 0 : i32
    %c0_i32_0 = arith.constant 0 : i32
    %c0_i32_1 = arith.constant 0 : i32
    return %arg0, %c0_i32, %c0_i32_0 : i32, i32, i32
  }
}

</mosaic_0001>

<bundles_post_ra>
// kernel: tpu_custom_call.1
= control target key start
LH: loop header
LB: loop body
LE: loop exit
PB: predicated region body
PF: predicated region fallthrough
CT: control target
= control target key end

     0   :  { %8 = vsyncpa [#allocation3], 0  ;;  %s752_s0 = inlined_call_operand.vmem [shape: f32[2,4,256], index: 0, kind: input, shape index: {}]   ;;  %s753_s1 = inlined_call_operand.vmem [shape: f32[24,4], index: 1, kind: input, shape index: {}]   ;;  %s754_s2 = inlined_call_operand.vmem [shape: f32[24,1], index: 2, kind: input, shape index: {}]   ;;  %s755_s3 = inlined_call_operand.hbm [shape: f32[2,4,256], index: 3, kind: output, shape index: {}]  }
   0x1   :  { %10 = vsyncpa [#allocation3 + $0x1], 0  ;;  %s632_s12 = smov 0   ;;  %s634_s13 = smov 0  }
   0x2   :  { %s636_s14 = smov 0   ;;  %s638_s15 = smov 0  }
   0x3 LB: > { %s653_s16 = sadd.s32 4294967295, %s609_s15   ;;  %s476_s17 = sadd.s32 4294967294, %s609_s15   ;;  %s609_s15 = sphi %s638_s15, %s761_s15   ;;  %s605_s14 = sphi %s636_s14, %s760_s14   ;;  %s601_s13 = sphi %s634_s13, %s759_s13   ;;  %s597_s12 = sphi %s632_s12, %s758_s12  }
   0x4   : > { %s657_s18 = sadd.s32 1, %s609_s15   ;;  %s91_s19 = sadd.s32 1, %s605_s14 }
   0x5   : > { %s88_s20 = ssub.s32 %s609_s15, %s657_s18  ;;  %p101_p0 = scmp.ne.s32.totalorder %s605_s14, %s601_s13 }
   0x6   : > { %p89_p1 = scmp.eq.s32.totalorder %s88_s20, 0  ;;  %p102_p2 = scmp.eq.s32.totalorder %s653_s16, 1 }
   0x7   : > { %p107_p3 = scmp.ne.s32.totalorder %s601_s13, %s597_s12  ;;  %p108_p4 = scmp.eq.s32.totalorder %s476_s17, 1 }
   0x8   : > { %s668_s21 = scalar_select %p89_p1, %s605_s14, %s91_s19  }
   0x9   : > { %p670_p5 = por %p102_p2, %p101_p0  ;;  %p674_p6 = por %p108_p4, %p107_p3 }
   0xa   : > { %p479_p7 = scmp.ge.s32.totalorder %s609_s15, 1  ;;  %p140_p8 = scmp.lt.s32.totalorder %s609_s15, 3 }
   0xc   : > { %p141_p9 = pnand %p479_p7, %p140_p8 }
   0xd   : > { %p164_p10 = scmp.lt.s32.totalorder (!%p141_p9), %s653_s16, 1  ;;  %s161_s20 = sand.u32 (!%p141_p9), 1, %s601_s13  }
   0xe   : > { %144 = sbr.rel (%p141_p9) target bundleno = 855 (0x357), region = 32  ;;  %s480_s24 = sshll.u32 (!%p141_p9), %s161_s20, 3 }
   0xf   : > { %s499_s25 = sshll.u32 (!%p141_p9), %s653_s16, 3  ;;  %s163_s29 = scalar_lea.vmem (!%p141_p9), [#allocation2], %s480_s24 }
  0x10   : > { %s412_s28 = scalar_lea.hbm (!%p141_p9), %s755_s3, %s499_s25  ;;  %s401_s5 = scalar_lea.sflag (!%p141_p9), [#allocation3], %s161_s20 }
  0x11   : > { %s416_s4 = sshll.u32 (!%p141_p9), %s412_s28, 4  ;;  %s567_s9 = scalar_lea.hbm (!%p141_p9), %s755_s3, 16  ;;  %s417_s4 = int_to_ptr.hbm [resolvable:$true] %s416_s4 }
  0x13   : > { %v174_v0 = vld [vmem:[%s754_s2 + $0x8] sm:$0xff]  ;;  %v611_v1 = vmov 0   ;;  %s165_s26 = scalar_select %p164_p10, %s653_s16, 1  ;;  %v173_v3 = vld [vmem:[%s754_s2] sm:$0xff]  ;;  %vm205_vm0 = vcmask 1043456   ;;  %vm195_vm1 = vcmask 31744   ;;  %v302_v18 = vlaneseq }
  0x14   : > { %541 = vset.pattern.permute.xlu0 %v611_v1  ;;  %542 = vset.pattern.permute.xlu2 %v611_v1  ;;  %v170_v4 = vld [vmem:[%s753_s1] sm:$0xff]  ;;  %v171_v7 = vld [vmem:[%s753_s1 + $0x8] sm:$0xff]  ;;  %vm306_vm3 = vcmask 64512   ;;  %v172_v25 = vld [vmem:[%s753_s1 + $0x10] sm:$0xff]  ;;  %s561_s16 = sshra.s32 %s417_s4, 4  ;;  %s562_s16 = int_to_ptr.hbm [resolvable:$true] %s561_s16 }
  0x15   : > { %183 = vperm.xlu0 %541, %v174_v0   ;;  %s498_s27 = sshll.u32 %s165_s26, 3  ;;  %v303_v19 = vand.u32 127, %v302_v18  ;;  %v175_v26 = vld [vmem:[%s754_s2 + $0x10] sm:$0xff]  ;;  %s563_s6 = scalar_lea.hbm %s562_s16, 8 }
  0x16   : > { %s168_s30 = scalar_lea.vmem %s752_s0, %s498_s27  ;;  %188 = vperm.xlu2 %542, %v175_v26   ;;  %p564_p11 = scmp.ne.s32.totalorder %s562_s16, %s563_s6 }
  0x17   : > { %v688_v2 = vld [vmem:[%s168_s30] sm:$0xff]  ;;  %vm304_vm2 = vcmp.lt.s32.totalorder %v303_v19, 4  ;;  %s414_s30 = sshll.u32 %s163_s29, 4  ;;  %p568_p0 = scmp.lt.s32.totalorder %s562_s16, %s755_s3  ;;  %s415_s30 = int_to_ptr.vmem [resolvable:$true] %s414_s30 }
  0x18   : > { %192 = vst [vmem:[#allocation1] ss:$2 sm:$0xff] %v688_v2  ;;  %p565_p12 = pnand %p564_p11, %p670_p5  ;;  %p569_p1 = scmp.lt.s32.totalorder %s567_s9, %s563_s6 }
  0x1a   : > { %p566_p13 = pneg %p565_p12  ;;  %p570_p2 = por %p569_p1, %p568_p0 }
  0x1c   : > { %p571_p3 = pnand %p570_p2, %p566_p13 }
  0x1d   : > { %178 = vperm.xlu0 %541, %v173_v3  }
  0x1f   : > { %v193_v5 = vld.sshfl [vmem:[#allocation1] sm:$0xff pattern:$0x75316420]  ;;  %v194_v6 = vld.sshfl [vmem:[#allocation1 + $0x8] sm:$0xff pattern:$0x75316420] }
  0x20   : > { %483 = vmatpush.msk.msra.mxu0 %vm205_vm0, %v193_v5  ;;  %487 = vmatpush.msk.msra.mxu1 %vm205_vm0, %v194_v6 }
  0x21   : > { %484 = vmatmul.msk.f32.vlgmr.msra.gmra.mxu0 %vm195_vm1, %v170_v4  ;;  %488 = vmatmul.msk.f32.vlgmr.msra.gmra.mxu1 %vm195_vm1, %v170_v4 }
  0x29   : > { %485 = vmatmul.msk.f32.gmra.mxu0 %vm195_vm1, %v171_v7  ;;  %489 = vmatmul.msk.f32.gmra.mxu1 %vm195_vm1, %v171_v7 }
  0x31   : > { %486 = vmatmul.msk.f32.gmra.mxu0 %vm195_vm1, %v172_v25  ;;  %490 = vmatmul.msk.f32.gmra.mxu1 %vm195_vm1, %v172_v25 }
  0x70   : > { %v189_v32 = vpop.permute.xlu2 %188 }
  0x87   : > { %v184_v8 = vpop.permute.xlu0 %183 }
  0x8f   : > { %v179_v13 = vpop.permute.xlu0 %178 }
  0x9e   : > { %v227_v9 = vpop.f32.mrf.mxu0  ;;  %v253_v10 = vpop.f32.mrf.mxu1 }
  0x9f   : > { %v228_v16 = vadd.f32 %v227_v9, %v179_v13  ;;  %v254_v17 = vadd.f32 %v253_v10, %v179_v13 }
  0xa6   : > { %v230_v11 = vpop.f32.mrf.mxu0  ;;  %v256_v12 = vpop.f32.mrf.mxu1 }
  0xa7   : > { %v231_v14 = vadd.f32 %v230_v11, %v184_v8  ;;  %v257_v15 = vadd.f32 %v256_v12, %v184_v8 }
  0xa9   : > { %277 = vmatpush.xpose.msra.mxu2 %v231_v14  ;;  %297 = vmatpush.xpose.msra.mxu3 %v257_v15 }
  0xac   : > { %278 = vmatmul.f32.vlgmr.msra.gmra.mxu2 %v228_v16  ;;  %298 = vmatmul.f32.vlgmr.msra.gmra.mxu3 %v254_v17 }
  0xae   : > { %v233_v33 = vpop.f32.mrf.mxu0  ;;  %v259_v34 = vpop.f32.mrf.mxu1 }
  0xaf   : > { %v234_v35 = vadd.f32 %v233_v33, %v189_v32  ;;  %v260_v36 = vadd.f32 %v259_v34, %v189_v32 }
  0xb1   : > { %368 = vmatpush.msrb.mxu2 %v234_v35  ;;  %388 = vmatpush.msrb.mxu3 %v260_v36 }
 0x12f   : > { %v279_v20 = vpop.f32.mrf.mxu2  ;;  %v299_v21 = vpop.f32.mrf.mxu3 }
 0x130   : > { %v300_v22 = vadd.f32 %v299_v21, %v279_v20 }
 0x132   : > { %v305_v23 = vsel %vm304_vm2, %v300_v22, -1e+30 }
 0x133   : > { %v307_v24 = vsel %vm306_vm3, %v305_v23, -inf }
 0x134   : > { %308 = vmax.xlane.f32.xlu1 %v307_v24 }
 0x1a7   : > { %v309_v27 = vpop.xlane.xlu1 %308 }
 0x1a8   : > { %v310_v28 = vsub.f32 %v305_v23, %v309_v27 }
 0x1aa   : > { %v311_v29 = vmul.f32 1.442695, %v310_v28 }
 0x1ac   : > { %543 = vpow2.f32 %v311_v29 }
 0x1b2   : > { %v544_v30 = vpop.eup %543 }
 0x1b3   : > { %v313_v31 = vsel %vm306_vm3, %v544_v30, 0.0 }
 0x1b4   : > { %314 = vadd.xlane.f32.xlu1 %v313_v31 }
 0x227   : > { %v315_v37 = vpop.xlane.xlu1 %314 }
 0x228   : > { %545 = vrcp.f32 %v315_v37 }
 0x22e   : > { %v546_v38 = vpop.eup %545 }
 0x22f   : > { %v317_v39 = vmul.f32 %v546_v38, %v544_v30 }
 0x231   : > { %318 = vxpose.xlu2.b32.start.end [1/1] (short) (narrow) %v317_v39, 8 }
 0x2ca   : > { %v334_v40 = vpop.trf.xlu2 }
 0x2cb   : > { %491 = vmatmul.msk.f32.vlgmr.msrb.gmra.mxu2 %vm306_vm3, %v334_v40  ;;  %492 = vmatmul.msk.f32.vlgmr.msrb.gmra.mxu3 %vm306_vm3, %v334_v40 }
 0x34e   : > { %v390_v41 = vpop.f32.mrf.mxu3  ;;  %v370_v43 = vpop.f32.mrf.mxu2 }
 0x34f   : > { %v395_v42 = vrot.slane %v390_v41, 4 }
 0x351   : > { %v396_v44 = vsel %vm205_vm0, %v370_v43, %v395_v42 }
 0x352   : > { %v398_v45 = vadd.f32 %v396_v44, %v688_v2 }
 0x354   : > { %399 = vst [vmem:[%s163_s29] sm:$0xff] %v398_v45 }
 0x355   : > { %574 = shalt.err (!%p571_p3)
}
 0x356   : > { %500 = dma.vmem_to_hbm [thread:$0]  (%p670_p5), %s415_s30, 128, %s417_s4, %s401_s5  }
 0x357 PF: > { %p506_p4 = scmp.ge.s32.totalorder %s609_s15, 2  ;;  %s428_s17 = sand.u32 1, %s597_s12  }
 0x358   : > { %s429_s19 = scalar_lea.sflag [#allocation3], %s428_s17 }
 0x359   : > { %p503_p7 = pnand %p506_p4, %p674_p6 }
 0x35b   : > { %p504_p8 = pneg %p503_p7 }
 0x35d   : > { %592 = dma.done.wait (%p504_p8), %s429_s19, 128  }
 0x35e   : > { %594 = vsyncadd (%p504_p8), %s429_s19, 4294967168  ;;  %p13_p9 = scmp.ge.s32.totalorder %s657_s18, 4   ;;  %s758_s12 = smov %s601_s13 }
 0x35f   : > { %s759_s13 = smov %s605_s14  ;;  %s760_s14 = smov %s668_s21 }
 0x360   : > { %s761_s15 = smov %s657_s18  ;;  %15 = sbr.rel (!%p13_p9) target bundleno = 3 (0x3), region = 67 }
 0x365   :  { %435 = vsyncpa [#allocation3], 1 }
 0x366   :  { %437 = vsyncpa [#allocation3 + $0x1], 1 }

</bundles_post_ra>
